<compile_context>
chip_gen: v6e
topology: v6e:2x2x1
jax: 0.10.0
libtpu: 0.0.40
codegen_flags: <defaults>
</compile_context>

<pallas_src>
import functools

import jax
import jax.numpy as jnp
from jax.experimental import pallas as pl
from jax.experimental.pallas import tpu as pltpu

SUBLANE = 8  # batch-tile row alignment


def _cdiv(a, b):
    return (a + b - 1) // b


def _round_up(n, m):
    return _cdiv(n, m) * m


def mlp_kernel(x_ref,
               w1_ref, b1_ref,
               w2_ref, b2_ref,
               w3_ref, b3_ref,
               w4_ref, b4_ref,
               o_ref):
    """One batch tile: 4 fused Linear(+ReLU) layers, all operands in VMEM."""
    cdt = w1_ref.dtype  # matmul-operand dtype (f32 or bf16); accumulation is f32.

    h = jnp.dot(x_ref[...].astype(cdt), w1_ref[...],
                preferred_element_type=jnp.float32) + b1_ref[...]
    h = jnp.maximum(h, 0.0)

    h = jnp.dot(h.astype(cdt), w2_ref[...],
                preferred_element_type=jnp.float32) + b2_ref[...]
    h = jnp.maximum(h, 0.0)

    h = jnp.dot(h.astype(cdt), w3_ref[...],
                preferred_element_type=jnp.float32) + b3_ref[...]
    h = jnp.maximum(h, 0.0)

    q = jnp.dot(h.astype(cdt), w4_ref[...],
                preferred_element_type=jnp.float32) + b4_ref[...]
    o_ref[...] = q.astype(o_ref.dtype)


@functools.partial(jax.jit, static_argnames=("block_batch", "use_bf16"))
def dqn_forward(x, params, *, block_batch=2048, use_bf16=False):
    """x: (batch, state_size).  params: transposed weights (in,out) + (1,out) biases."""
    batch, state_size = x.shape
    action_size = params["w4"].shape[1]
    dims = [state_size, 64, 64, 128, action_size]

    mat_dtype = jnp.bfloat16 if use_bf16 else jnp.float32
    ws = [params[f"w{i}"].astype(mat_dtype) for i in range(1, 5)]
    bs = [params[f"b{i}"].astype(jnp.float32) for i in range(1, 5)]

    # Even batch split into 8-row-aligned tiles; no near-empty trailing tile.
    num_tiles = max(1, _cdiv(batch, block_batch))
    tb = _round_up(_cdiv(batch, num_tiles), SUBLANE)
    padded_batch = tb * num_tiles

    # Only pad batch rows (never the feature dim); skip the copy if not needed.
    if padded_batch != batch:
        xp = jnp.pad(x, ((0, padded_batch - batch), (0, 0)))
    else:
        xp = x

    resident = lambda i: (0, 0)  # weights / biases stay put across grid steps
    in_specs = [pl.BlockSpec((tb, state_size), lambda i: (i, 0))]
    for din, dout in zip(dims[:-1], dims[1:]):
        in_specs.append(pl.BlockSpec((din, dout), resident))
        in_specs.append(pl.BlockSpec((1, dout), resident))
    out_spec = pl.BlockSpec((tb, action_size), lambda i: (i, 0))

    flops = 2 * padded_batch * sum(a * b for a, b in zip(dims[:-1], dims[1:]))
    bytes_accessed = (xp.size * xp.dtype.itemsize
                      + sum(w.size * w.dtype.itemsize for w in ws)
                      + sum(b.size * b.dtype.itemsize for b in bs)
                      + padded_batch * action_size * 4)

    q = pl.pallas_call(
        mlp_kernel,
        out_shape=jax.ShapeDtypeStruct((padded_batch, action_size), jnp.float32),
        grid=(num_tiles,),
        in_specs=in_specs,
        out_specs=out_spec,
        compiler_params=pltpu.CompilerParams(
            dimension_semantics=("parallel",)),
        cost_estimate=pl.CostEstimate(
            flops=flops, transcendentals=0, bytes_accessed=bytes_accessed),
    )(xp, ws[0], bs[0], ws[1], bs[1], ws[2], bs[2], ws[3], bs[3])

    if padded_batch != batch:
        q = q[:batch]
    return q


def init_params(key, state_size, action_size):
    """PyTorch nn.Linear default init: W, b ~ U(-1/sqrt(fan_in), 1/sqrt(fan_in)).
    Weights stored transposed as (in, out)."""
    sizes = [(state_size, 64), (64, 64), (64, 128), (128, action_size)]
    params = {}
    for i, (fan_in, fan_out) in enumerate(sizes, start=1):
        key, kw, kb = jax.random.split(key, 3)
        bound = 1.0 / (fan_in ** 0.5)
        params[f"w{i}"] = jax.random.uniform(
            kw, (fan_in, fan_out), jnp.float32, minval=-bound, maxval=bound)
        params[f"b{i}"] = jax.random.uniform(
            kb, (1, fan_out), jnp.float32, minval=-bound, maxval=bound)
    return params


def reference_forward_f32(x, params):
    h = jnp.maximum(x @ params["w1"] + params["b1"], 0.0)
    h = jnp.maximum(h @ params["w2"] + params["b2"], 0.0)
    h = jnp.maximum(h @ params["w3"] + params["b3"], 0.0)
    return h @ params["w4"] + params["b4"]


def reference_forward_bf16(x, params):
    def dot(a, w):
        return jnp.dot(a.astype(jnp.bfloat16), w.astype(jnp.bfloat16),
                       preferred_element_type=jnp.float32)
    h = jnp.maximum(dot(x, params["w1"]) + params["b1"], 0.0)
    h = jnp.maximum(dot(h, params["w2"]) + params["b2"], 0.0)
    h = jnp.maximum(dot(h, params["w3"]) + params["b3"], 0.0)
    return dot(h, params["w4"]) + params["b4"]


if __name__ == "__main__":
    state_size, action_size = 16, 4

    key = jax.random.PRNGKey(0)
    key, kx = jax.random.split(key)
    params = init_params(key, state_size, action_size)

    # --- small demo batch (single tile), exact-f32 path (default) ---
    x = jax.random.normal(kx, (8, state_size), dtype=jnp.float32)
    q = jax.block_until_ready(dqn_forward(x, params))
    assert q.shape == (8, action_size)
    assert jnp.allclose(q, reference_forward_f32(x, params), atol=1e-4, rtol=1e-4)

    # --- bf16 MXU-operand path (optional faster numerics) ---
    qb = jax.block_until_ready(dqn_forward(x, params, use_bf16=True))
    assert jnp.allclose(qb, reference_forward_bf16(x, params), atol=1e-3, rtol=1e-3)
    assert jnp.allclose(qb, reference_forward_f32(x, params), atol=1e-1, rtol=1e-1)

    # --- ragged batch exercising the grid: 21 rows, block_batch=8 -> 3 even 8-row tiles ---
    key, kx2 = jax.random.split(key)
    x2 = jax.random.normal(kx2, (21, state_size), dtype=jnp.float32)
    q2 = jax.block_until_ready(dqn_forward(x2, params, block_batch=8))
    assert q2.shape == (21, action_size)
    assert jnp.allclose(q2, reference_forward_f32(x2, params), atol=1e-4, rtol=1e-4)

    # TODO(synk): the module's Adam optimizer / MSELoss / device plumbing are training
    # infrastructure, not part of the forward pass, and are not translated.

    print("KERNEL_OK")
</pallas_src>

<mosaic_0001>
module attributes {stable_mosaic.version = 11 : i64} {
  func.func @mlp_kernel(%arg0: i32, %arg1: memref<8x16xf32, #tpu.memory_space<vmem>>, %arg2: memref<16x64xf32, #tpu.memory_space<vmem>>, %arg3: memref<1x64xf32, #tpu.memory_space<vmem>>, %arg4: memref<64x64xf32, #tpu.memory_space<vmem>>, %arg5: memref<1x64xf32, #tpu.memory_space<vmem>>, %arg6: memref<64x128xf32, #tpu.memory_space<vmem>>, %arg7: memref<1x128xf32, #tpu.memory_space<vmem>>, %arg8: memref<128x4xf32, #tpu.memory_space<vmem>>, %arg9: memref<1x4xf32, #tpu.memory_space<vmem>>, %arg10: memref<8x4xf32, #tpu.memory_space<vmem>>) attributes {dimension_semantics = [#tpu.dimension_semantics<parallel>], iteration_bounds = array<i64: 1>, scalar_prefetch = 0 : i64, scratch_operands = 0 : i64, tpu.core_type = #tpu.core_type<tc>, window_params = [{transform_indices = @transform_0, window_bounds = array<i64: 8, 16>}, {pipeline_mode = #tpu.pipeline_mode<synchronous>, transform_indices = @transform_1, window_bounds = array<i64: 16, 64>}, {pipeline_mode = #tpu.pipeline_mode<synchronous>, transform_indices = @transform_2, window_bounds = array<i64: 1, 64>}, {pipeline_mode = #tpu.pipeline_mode<synchronous>, transform_indices = @transform_3, window_bounds = array<i64: 64, 64>}, {pipeline_mode = #tpu.pipeline_mode<synchronous>, transform_indices = @transform_4, window_bounds = array<i64: 1, 64>}, {pipeline_mode = #tpu.pipeline_mode<synchronous>, transform_indices = @transform_5, window_bounds = array<i64: 64, 128>}, {pipeline_mode = #tpu.pipeline_mode<synchronous>, transform_indices = @transform_6, window_bounds = array<i64: 1, 128>}, {pipeline_mode = #tpu.pipeline_mode<synchronous>, transform_indices = @transform_7, window_bounds = array<i64: 128, 4>}, {pipeline_mode = #tpu.pipeline_mode<synchronous>, transform_indices = @transform_8, window_bounds = array<i64: 1, 4>}, {transform_indices = @transform_9, window_bounds = array<i64: 8, 4>}]} {
    %c0 = arith.constant 0 : index
    %c0_0 = arith.constant 0 : index
    %0 = vector.load %arg1[%c0, %c0_0] : memref<8x16xf32, #tpu.memory_space<vmem>>, vector<8x16xf32>
    %c0_1 = arith.constant 0 : index
    %c0_2 = arith.constant 0 : index
    %1 = vector.load %arg2[%c0_1, %c0_2] : memref<16x64xf32, #tpu.memory_space<vmem>>, vector<16x64xf32>
    %cst = arith.constant dense<0.000000e+00> : vector<8x64xf32>
    %2 = tpu.matmul %0, %1, %cst {dimension_numbers = #tpu.dot_dimension_numbers<[1], [0], [0], [1], [0, 0, 1, 1], [], []>} : vector<8x16xf32>, vector<16x64xf32>, vector<8x64xf32> -> vector<8x64xf32>
    %c0_3 = arith.constant 0 : index
    %c0_4 = arith.constant 0 : index
    %3 = vector.load %arg3[%c0_3, %c0_4] : memref<1x64xf32, #tpu.memory_space<vmem>>, vector<1x64xf32>
    %4 = vector.broadcast %3 : vector<1x64xf32> to vector<8x64xf32>
    %5 = arith.addf %2, %4 : vector<8x64xf32>
    %cst_5 = arith.constant 0.000000e+00 : f32
    %6 = vector.broadcast %cst_5 : f32 to vector<8x64xf32>
    %7 = arith.maximumf %5, %6 : vector<8x64xf32>
    %c0_6 = arith.constant 0 : index
    %c0_7 = arith.constant 0 : index
    %8 = vector.load %arg4[%c0_6, %c0_7] : memref<64x64xf32, #tpu.memory_space<vmem>>, vector<64x64xf32>
    %cst_8 = arith.constant dense<0.000000e+00> : vector<8x64xf32>
    %9 = tpu.matmul %7, %8, %cst_8 {dimension_numbers = #tpu.dot_dimension_numbers<[1], [0], [0], [1], [0, 0, 1, 1], [], []>} : vector<8x64xf32>, vector<64x64xf32>, vector<8x64xf32> -> vector<8x64xf32>
    %c0_9 = arith.constant 0 : index
    %c0_10 = arith.constant 0 : index
    %10 = vector.load %arg5[%c0_9, %c0_10] : memref<1x64xf32, #tpu.memory_space<vmem>>, vector<1x64xf32>
    %11 = vector.broadcast %10 : vector<1x64xf32> to vector<8x64xf32>
    %12 = arith.addf %9, %11 : vector<8x64xf32>
    %cst_11 = arith.constant 0.000000e+00 : f32
    %13 = vector.broadcast %cst_11 : f32 to vector<8x64xf32>
    %14 = arith.maximumf %12, %13 : vector<8x64xf32>
    %c0_12 = arith.constant 0 : index
    %c0_13 = arith.constant 0 : index
    %15 = vector.load %arg6[%c0_12, %c0_13] : memref<64x128xf32, #tpu.memory_space<vmem>>, vector<64x128xf32>
    %cst_14 = arith.constant dense<0.000000e+00> : vector<8x128xf32>
    %16 = tpu.matmul %14, %15, %cst_14 {dimension_numbers = #tpu.dot_dimension_numbers<[1], [0], [0], [1], [0, 0, 1, 1], [], []>} : vector<8x64xf32>, vector<64x128xf32>, vector<8x128xf32> -> vector<8x128xf32>
    %c0_15 = arith.constant 0 : index
    %c0_16 = arith.constant 0 : index
    %17 = vector.load %arg7[%c0_15, %c0_16] : memref<1x128xf32, #tpu.memory_space<vmem>>, vector<1x128xf32>
    %18 = vector.broadcast %17 : vector<1x128xf32> to vector<8x128xf32>
    %19 = arith.addf %16, %18 : vector<8x128xf32>
    %cst_17 = arith.constant 0.000000e+00 : f32
    %20 = vector.broadcast %cst_17 : f32 to vector<8x128xf32>
    %21 = arith.maximumf %19, %20 : vector<8x128xf32>
    %c0_18 = arith.constant 0 : index
    %c0_19 = arith.constant 0 : index
    %22 = vector.load %arg8[%c0_18, %c0_19] : memref<128x4xf32, #tpu.memory_space<vmem>>, vector<128x4xf32>
    %cst_20 = arith.constant dense<0.000000e+00> : vector<8x4xf32>
    %23 = tpu.matmul %21, %22, %cst_20 {dimension_numbers = #tpu.dot_dimension_numbers<[1], [0], [0], [1], [0, 0, 1, 1], [], []>} : vector<8x128xf32>, vector<128x4xf32>, vector<8x4xf32> -> vector<8x4xf32>
    %c0_21 = arith.constant 0 : index
    %c0_22 = arith.constant 0 : index
    %24 = vector.load %arg9[%c0_21, %c0_22] : memref<1x4xf32, #tpu.memory_space<vmem>>, vector<1x4xf32>
    %25 = vector.broadcast %24 : vector<1x4xf32> to vector<8x4xf32>
    %26 = arith.addf %23, %25 : vector<8x4xf32>
    %c0_23 = arith.constant 0 : index
    %c0_24 = arith.constant 0 : index
    %27 = vector.load %arg10[%c0_23, %c0_24] : memref<8x4xf32, #tpu.memory_space<vmem>>, vector<8x4xf32>
    tpu.vector_store %arg10[%c0_23, %c0_24], %26 {strides = array<i32>} : memref<8x4xf32, #tpu.memory_space<vmem>>, vector<8x4xf32>,
    return
  }
  func.func @transform_0(%arg0: i32) -> (i32, i32) {
    %c0_i32 = arith.constant 0 : i32
    %c0_i32_0 = arith.constant 0 : i32
    return %arg0, %c0_i32 : i32, i32
  }
  func.func @transform_1(%arg0: i32) -> (i32, i32) {
    %c0_i32 = arith.constant 0 : i32
    %c0_i32_0 = arith.constant 0 : i32
    %c0_i32_1 = arith.constant 0 : i32
    return %c0_i32, %c0_i32_0 : i32, i32
  }
  func.func @transform_2(%arg0: i32) -> (i32, i32) {
    %c0_i32 = arith.constant 0 : i32
    %c0_i32_0 = arith.constant 0 : i32
    %c0_i32_1 = arith.constant 0 : i32
    return %c0_i32, %c0_i32_0 : i32, i32
  }
  func.func @transform_3(%arg0: i32) -> (i32, i32) {
    %c0_i32 = arith.constant 0 : i32
    %c0_i32_0 = arith.constant 0 : i32
    %c0_i32_1 = arith.constant 0 : i32
    return %c0_i32, %c0_i32_0 : i32, i32
  }
  func.func @transform_4(%arg0: i32) -> (i32, i32) {
    %c0_i32 = arith.constant 0 : i32
    %c0_i32_0 = arith.constant 0 : i32
    %c0_i32_1 = arith.constant 0 : i32
    return %c0_i32, %c0_i32_0 : i32, i32
  }
  func.func @transform_5(%arg0: i32) -> (i32, i32) {
    %c0_i32 = arith.constant 0 : i32
    %c0_i32_0 = arith.constant 0 : i32
    %c0_i32_1 = arith.constant 0 : i32
    return %c0_i32, %c0_i32_0 : i32, i32
  }
  func.func @transform_6(%arg0: i32) -> (i32, i32) {
    %c0_i32 = arith.constant 0 : i32
    %c0_i32_0 = arith.constant 0 : i32
    %c0_i32_1 = arith.constant 0 : i32
    return %c0_i32, %c0_i32_0 : i32, i32
  }
  func.func @transform_7(%arg0: i32) -> (i32, i32) {
    %c0_i32 = arith.constant 0 : i32
    %c0_i32_0 = arith.constant 0 : i32
    %c0_i32_1 = arith.constant 0 : i32
    return %c0_i32, %c0_i32_0 : i32, i32
  }
  func.func @transform_8(%arg0: i32) -> (i32, i32) {
    %c0_i32 = arith.constant 0 : i32
    %c0_i32_0 = arith.constant 0 : i32
    %c0_i32_1 = arith.constant 0 : i32
    return %c0_i32, %c0_i32_0 : i32, i32
  }
  func.func @transform_9(%arg0: i32) -> (i32, i32) {
    %c0_i32 = arith.constant 0 : i32
    %c0_i32_0 = arith.constant 0 : i32
    return %arg0, %c0_i32 : i32, i32
  }
}

</mosaic_0001>

<bundles_post_ra>
// kernel: dqn_forward.1
= control target key start
LH: loop header
LB: loop body
LE: loop exit
PB: predicated region body
PF: predicated region fallthrough
CT: control target
= control target key end

     0   :  { %14 = vsyncpa [#allocation3], 0  ;;  %s815_s0 = inlined_call_operand.hbm [shape: f32[8,16], index: 0, kind: input, shape index: {}]   ;;  %s816_s1 = inlined_call_operand.hbm [shape: f32[16,64], index: 1, kind: input, shape index: {}]   ;;  %s817_s2 = inlined_call_operand.vmem [shape: f32[1,64], index: 2, kind: input, shape index: {}]   ;;  %s818_s3 = inlined_call_operand.vmem [shape: f32[64,64], index: 3, kind: input, shape index: {}]   ;;  %s819_s4 = inlined_call_operand.vmem [shape: f32[1,64], index: 4, kind: input, shape index: {}]   ;;  %s820_s5 = inlined_call_operand.vmem [shape: f32[64,128], index: 5, kind: input, shape index: {}]   ;;  %s821_s6 = inlined_call_operand.vmem [shape: f32[1,128], index: 6, kind: input, shape index: {}]   ;;  %s822_s7 = inlined_call_operand.vmem [shape: f32[128,4], index: 7, kind: input, shape index: {}]   ;;  %s823_s8 = inlined_call_operand.vmem [shape: f32[1,4], index: 8, kind: input, shape index: {}]   ;;  %s824_s9 = inlined_call_operand.vmem [shape: f32[8,4], index: 9, kind: output, shape index: {}]  }
   0x1   :  { %15 = vsyncpa [#allocation5], 0  ;;  %s598_s30 = smov [#allocation2]   ;;  %s599_s11 = smov [#allocation4]  }
   0x2   :  { %s22_s10 = sshll.u32 %s598_s30, 4  ;;  %s31_s12 = sshll.u32 %s599_s11, 4  ;;  %s23_s10 = int_to_ptr.vmem [resolvable:$true] %s22_s10  ;;  %s32_s12 = int_to_ptr.vmem [resolvable:$true] %s31_s12 }
   0x3   :  { %s562_s13 = scalar_lea.vmem %s23_s10, 128  ;;  %p567_p1 = scmp.lt.s32.totalorder %s23_s10, %s23_s10 }
   0x4   :  { %p563_p0 = scmp.ne.s32.totalorder %s23_s10, %s562_s13  ;;  %p568_p2 = scmp.lt.s32.totalorder %s562_s13, %s562_s13 }
   0x6   :  { %p569_p3 = por %p568_p2, %p567_p1 }
   0x8   :  { %p570_p4 = pnand %p569_p3, %p563_p0 }
   0xa   :  { %573 = shalt.err (!%p570_p4)
}
   0xb   :  { %25 = dma.hbm_to_vmem [thread:$0]  %s815_s0, 128, %s23_s10, [#allocation3]  }
   0xc   :  { %s582_s16 = scalar_lea.vmem %s32_s12, 256  ;;  %p587_p6 = scmp.lt.s32.totalorder %s32_s12, %s32_s12 }
   0xd   :  { %p583_p5 = scmp.ne.s32.totalorder %s32_s12, %s582_s16  ;;  %p588_p7 = scmp.lt.s32.totalorder %s582_s16, %s582_s16 }
   0xf   :  { %p589_p8 = por %p588_p7, %p587_p6 }
  0x11   :  { %p590_p9 = pnand %p589_p8, %p583_p5 }
  0x13   :  { %593 = shalt.err (!%p590_p9)
}
  0x14   :  { %s600_s17 = smov 128   ;;  %s601_s18 = smov 8  }
  0x15   :  { %37 = dma.hbm_to_vmem [thread:$0]  %s816_s1, 256, %s32_s12, [#allocation5], %s600_s17, %s600_s17, %s601_s18  }
  0x16   :  { %594 = dma.done.wait [#allocation3], 128  }
  0x17   :  { %595 = vsyncadd [#allocation3], 4294967168 }
  0x18   :  { %596 = dma.done.wait [#allocation5], 256  }
  0x19   :  { %597 = vsyncadd [#allocation5], 4294967040  ;;  %v602_v0 = vmov 0.0   ;;  %vm603_vm0 = vmmov 0   ;;  %v60_v1 = vld [vmem:[#allocation4 + $0x8] sm:$0xff]  ;;  %v59_v2 = vld [vmem:[#allocation4] sm:$0xff] }
  0x1a   :  { %468 = vmatprep.subr.mxu0 %v602_v0  ;;  %472 = vmatprep.mubr.msk.f32.mxu0 %vm603_vm0, %v602_v0  ;;  %v58_v3 = vld [vmem:[#allocation2] sm:$0xff]  ;;  %vm68_vm1 = vcmask 130048   ;;  %v150_v4 = vld [vmem:[%s818_s3 + $0x38] sm:$0xff]  ;;  %v149_v5 = vld [vmem:[%s818_s3 + $0x30] sm:$0xff]  ;;  %vm158_vm2 = vcmask 523264   ;;  %vm415_vm3 = vcmask 31744  }
  0x1b   :  { %513 = vmatprep.subr.mxu1 %v602_v0  ;;  %545 = vmatprep.mubr.msk.f32.mxu1 %vm603_vm0, %v602_v0  ;;  %v148_v6 = vld [vmem:[%s818_s3 + $0x28] sm:$0xff]  ;;  %v147_v7 = vld [vmem:[%s818_s3 + $0x20] sm:$0xff]  ;;  %v146_v8 = vld [vmem:[%s818_s3 + $0x18] sm:$0xff] }
  0x1c   :  { %469 = vmatpush3.msra.mxu0 %v60_v1  ;;  %v145_v9 = vld [vmem:[%s818_s3 + $0x10] sm:$0xff]  ;;  %v144_v10 = vld [vmem:[%s818_s3 + $0x8] sm:$0xff]  ;;  %v143_v11 = vld [vmem:[%s818_s3] sm:$0xff] }
  0x1d   :  { %470 = vmatprep.subr.mxu0 %v602_v0  ;;  %v423_v12 = vld [vmem:[%s817_s2] ss:$0 sm:$0xff]  ;;  %v240_v17 = vld [vmem:[%s820_s5 + $0x38] sm:$0xff]  ;;  %v239_v18 = vld [vmem:[%s820_s5 + $0x30] sm:$0xff] }
  0x1e   :  { %471 = vmatpush3.msra.mxu0 %v59_v2  ;;  %v238_v19 = vld [vmem:[%s820_s5 + $0x28] sm:$0xff]  ;;  %v237_v20 = vld [vmem:[%s820_s5 + $0x20] sm:$0xff]  ;;  %v236_v21 = vld [vmem:[%s820_s5 + $0x18] sm:$0xff] }
  0x1f   :  { %473 = vmatmul.mubr.msk.f32.vlgmr.msra.gmra.mxu0 %vm68_vm1, %v58_v3  ;;  %475 = vmatprep.subr.mxu0 %v602_v0  ;;  %v235_v22 = vld [vmem:[%s820_s5 + $0x10] sm:$0xff]  ;;  %v234_v23 = vld [vmem:[%s820_s5 + $0x8] sm:$0xff]  ;;  %v233_v24 = vld [vmem:[%s820_s5] sm:$0xff] }
  0x20   :  { %476 = vmatpush3.msra.mxu0 %v150_v4  ;;  %491 = vmatprep.mubr.msk.f32.mxu0 %vm603_vm0, %v602_v0  ;;  %v337_v25 = vld [vmem:[%s822_s7 + $0x78] sm:$0xff]  ;;  %v336_v26 = vld [vmem:[%s822_s7 + $0x70] sm:$0xff]  ;;  %v335_v27 = vld [vmem:[%s822_s7 + $0x68] sm:$0xff] }
  0x21   :  { %477 = vmatprep.subr.mxu0 %v602_v0  ;;  %514 = vmatpush3.msra.mxu1 %v337_v25  ;;  %v334_v28 = vld [vmem:[%s822_s7 + $0x60] sm:$0xff]  ;;  %v333_v29 = vld [vmem:[%s822_s7 + $0x58] sm:$0xff]  ;;  %v332_v30 = vld [vmem:[%s822_s7 + $0x50] sm:$0xff] }
  0x22   :  { %478 = vmatpush3.msra.mxu0 %v149_v5  ;;  %515 = vmatprep.subr.mxu1 %v602_v0  ;;  %v331_v31 = vld [vmem:[%s822_s7 + $0x48] sm:$0xff]  ;;  %v330_v32 = vld [vmem:[%s822_s7 + $0x40] sm:$0xff]  ;;  %v329_v33 = vld [vmem:[%s822_s7 + $0x38] sm:$0xff] }
  0x23   :  { %479 = vmatprep.subr.mxu0 %v602_v0  ;;  %516 = vmatpush3.msra.mxu1 %v336_v26  ;;  %v328_v34 = vld [vmem:[%s822_s7 + $0x30] sm:$0xff]  ;;  %v327_v35 = vld [vmem:[%s822_s7 + $0x28] sm:$0xff]  ;;  %v326_v36 = vld [vmem:[%s822_s7 + $0x20] sm:$0xff] }
  0x24   :  { %480 = vmatpush3.msra.mxu0 %v148_v6  ;;  %517 = vmatprep.subr.mxu1 %v602_v0  ;;  %v325_v37 = vld [vmem:[%s822_s7 + $0x18] sm:$0xff]  ;;  %v425_v38 = vld [vmem:[%s819_s4] ss:$0 sm:$0xff]  ;;  %v324_v43 = vld [vmem:[%s822_s7 + $0x10] sm:$0xff] }
  0x25   :  { %481 = vmatprep.subr.mxu0 %v602_v0  ;;  %518 = vmatpush3.msra.mxu1 %v335_v27  ;;  %v323_v44 = vld [vmem:[%s822_s7 + $0x8] sm:$0xff]  ;;  %v322_v45 = vld [vmem:[%s822_s7] sm:$0xff] }
  0x26   :  { %482 = vmatpush3.msra.mxu0 %v147_v7  ;;  %519 = vmatprep.subr.mxu1 %v602_v0  ;;  %v427_v46 = vld [vmem:[%s821_s6] ss:$0 sm:$0xff] }
  0x27   :  { %483 = vmatprep.subr.mxu0 %v602_v0  ;;  %520 = vmatpush3.msra.mxu1 %v334_v28  ;;  %v429_v51 = vld [vmem:[%s823_s8] ss:$0 sm:$0xff] }
  0x28   :  { %484 = vmatpush3.msra.mxu0 %v146_v8  ;;  %521 = vmatprep.subr.mxu1 %v602_v0 }
  0x29   :  { %485 = vmatprep.subr.mxu0 %v602_v0  ;;  %522 = vmatpush3.msra.mxu1 %v333_v29 }
  0x2a   :  { %486 = vmatpush3.msra.mxu0 %v145_v9  ;;  %523 = vmatprep.subr.mxu1 %v602_v0 }
  0x2b   :  { %487 = vmatprep.subr.mxu0 %v602_v0  ;;  %524 = vmatpush3.msra.mxu1 %v332_v30 }
  0x2c   :  { %488 = vmatpush3.msra.mxu0 %v144_v10  ;;  %525 = vmatprep.subr.mxu1 %v602_v0 }
  0x2d   :  { %489 = vmatprep.subr.mxu0 %v602_v0  ;;  %526 = vmatpush3.msra.mxu1 %v331_v31 }
  0x2e   :  { %490 = vmatpush3.msra.mxu0 %v143_v11  ;;  %527 = vmatprep.subr.mxu1 %v602_v0 }
  0x2f   :  { %494 = vmatprep.subr.mxu0 %v602_v0  ;;  %528 = vmatpush3.msra.mxu1 %v330_v32 }
  0x30   :  { %529 = vmatprep.subr.mxu1 %v602_v0 }
  0x31   :  { %530 = vmatpush3.msra.mxu1 %v329_v33 }
  0x32   :  { %531 = vmatprep.subr.mxu1 %v602_v0 }
  0x33   :  { %532 = vmatpush3.msra.mxu1 %v328_v34 }
  0x34   :  { %533 = vmatprep.subr.mxu1 %v602_v0 }
  0x35   :  { %534 = vmatpush3.msra.mxu1 %v327_v35 }
  0x36   :  { %535 = vmatprep.subr.mxu1 %v602_v0 }
  0x37   :  { %536 = vmatpush3.msra.mxu1 %v326_v36 }
  0x38   :  { %537 = vmatprep.subr.mxu1 %v602_v0 }
  0x39   :  { %538 = vmatpush3.msra.mxu1 %v325_v37 }
  0x3a   :  { %539 = vmatprep.subr.mxu1 %v602_v0 }
  0x3b   :  { %540 = vmatpush3.msra.mxu1 %v324_v43 }
  0x3c   :  { %541 = vmatprep.subr.mxu1 %v602_v0 }
  0x3d   :  { %542 = vmatpush3.msra.mxu1 %v323_v44 }
  0x3e   :  { %543 = vmatprep.subr.mxu1 %v602_v0 }
  0x3f   :  { %544 = vmatpush3.msra.mxu1 %v322_v45 }
  0xdf   :  { %v138_v13 = vpop.f32.mrf.mxu0 }
  0xe0   :  { %v139_v14 = vadd.f32 %v423_v12, %v138_v13 }
  0xe1   :  { %v474_v15 = vpop.f32.mrf.mxu0 }
  0xe2   :  { %v142_v16 = vmax.f32 %v139_v14, 0.0 }
  0xe4   :  { %492 = vmatmul.mubr.msk.f32.vlgmr.msra.gmra.mxu0 %vm158_vm2, %v142_v16 }
  0xe5   :  { %495 = vmatpush3.msra.mxu0 %v240_v17  ;;  %510 = vmatprep.mubr.msk.f32.mxu0 %vm603_vm0, %v602_v0 }
  0xe6   :  { %496 = vmatprep.subr.mxu0 %v602_v0 }
  0xe7   :  { %497 = vmatpush3.msra.mxu0 %v239_v18 }
  0xe8   :  { %498 = vmatprep.subr.mxu0 %v602_v0 }
  0xe9   :  { %499 = vmatpush3.msra.mxu0 %v238_v19 }
  0xea   :  { %500 = vmatprep.subr.mxu0 %v602_v0 }
  0xeb   :  { %501 = vmatpush3.msra.mxu0 %v237_v20 }
  0xec   :  { %502 = vmatprep.subr.mxu0 %v602_v0 }
  0xed   :  { %503 = vmatpush3.msra.mxu0 %v236_v21 }
  0xee   :  { %504 = vmatprep.subr.mxu0 %v602_v0 }
  0xef   :  { %505 = vmatpush3.msra.mxu0 %v235_v22 }
  0xf0   :  { %506 = vmatprep.subr.mxu0 %v602_v0 }
  0xf1   :  { %507 = vmatpush3.msra.mxu0 %v234_v23 }
  0xf2   :  { %508 = vmatprep.subr.mxu0 %v602_v0 }
  0xf3   :  { %509 = vmatpush3.msra.mxu0 %v233_v24 }
 0x1a4   :  { %v228_v39 = vpop.f32.mrf.mxu0 }
 0x1a5   :  { %v229_v40 = vadd.f32 %v425_v38, %v228_v39 }
 0x1a6   :  { %v493_v41 = vpop.f32.mrf.mxu0 }
 0x1a7   :  { %v232_v42 = vmax.f32 %v229_v40, 0.0 }
 0x1a9   :  { %511 = vmatmul.mubr.msk.f32.vlgmr.msra.gmra.mxu0 %vm158_vm2, %v232_v42 }
 0x269   :  { %v317_v47 = vpop.f32.mrf.mxu0 }
 0x26a   :  { %v318_v48 = vadd.f32 %v427_v46, %v317_v47 }
 0x26b   :  { %v512_v49 = vpop.f32.mrf.mxu0 }
 0x26c   :  { %v321_v50 = vmax.f32 %v318_v48, 0.0 }
 0x26e   :  { %546 = vmatmul.mubr.f32.vlgmr.msra.gmra.mxu1 %v321_v50 }
 0x32e   :  { %v411_v52 = vpop.f32.mrf.mxu1 }
 0x32f   :  { %v412_v53 = vadd.f32 %v429_v51, %v411_v52 }
 0x330   :  { %v547_v54 = vpop.f32.mrf.mxu1 }
 0x331   :  { %416 = vst.msk [vmem:[%s824_s9] sm:$0xff] %vm415_vm3, %v412_v53 }
 0x332   :  { %421 = vsyncpa [#allocation3], 1 }
 0x333   :  { %422 = vsyncpa [#allocation5], 1 }

</bundles_post_ra>
